<compile_context>
chip_gen: v7x
topology: tpu7x:2x2x1
jax: 0.10.0
libtpu: 0.0.40
codegen_flags: <defaults>
</compile_context>

<pallas_src>
import jax
import jax.numpy as jnp
from jax.experimental import pallas as pl
from jax.experimental.pallas import tpu as pltpu


def _ada_norm_kernel(temb_ref, w_msa_ref, w_mlp_ref, b_msa_ref, b_mlp_ref,
                     msa_ref, mlp_ref, acc_msa, acc_mlp):
    k = pl.program_id(1)

    @pl.when(k == 0)
    def _():
        acc_msa[...] = jnp.zeros_like(acc_msa)
        acc_mlp[...] = jnp.zeros_like(acc_mlp)

    # SiLU on the (B, tk) conditioning slice (tiny VPU/EUP work per tile).
    t = temb_ref[...].astype(jnp.float32)
    silu = t * jax.nn.sigmoid(t)

    # MXU matmuls, float32 accumulation.
    acc_msa[...] += jnp.dot(silu, w_msa_ref[...].astype(jnp.float32),
                            preferred_element_type=jnp.float32)
    acc_mlp[...] += jnp.dot(silu, w_mlp_ref[...].astype(jnp.float32),
                            preferred_element_type=jnp.float32)

    @pl.when(k == pl.num_programs(1) - 1)
    def _():
        msa_ref[...] = (acc_msa[...] + b_msa_ref[...]).astype(msa_ref.dtype)
        mlp_ref[...] = (acc_mlp[...] + b_mlp_ref[...]).astype(mlp_ref.dtype)


def _pick_tile(dim, preferred=(512, 256, 128)):
    for t in preferred:
        if dim % t == 0:
            return t
    return dim  # full-extent fallback (satisfies the BlockSpec full-dim rule)


def hunyuan_video_ada_norm(temb, linear_w, linear_b, *, tn=None, tk=None):
    """temb: (B, C); linear_w: (2*D, C) PyTorch nn.Linear layout; linear_b: (2*D,).
    Returns (gate_msa, gate_mlp), each (B, 1, D)."""
    B, C = temb.shape
    out_features = linear_w.shape[0]
    assert linear_w.shape == (out_features, C)
    assert out_features % 2 == 0
    D = out_features // 2

    # Pre-transpose / split the weight once (in production do this at
    # parameter-load time so it is entirely off the hot path).
    w_t = jnp.transpose(linear_w)            # (C, 2D)
    w_msa, w_mlp = w_t[:, :D], w_t[:, D:]    # (C, D) each
    b_msa = linear_b[:D].reshape(1, D)
    b_mlp = linear_b[D:].reshape(1, D)

    tn = tn or _pick_tile(D)
    tk = tk or _pick_tile(C)
    grid = (D // tn, C // tk)

    msa, mlp = pl.pallas_call(
        _ada_norm_kernel,
        out_shape=(jax.ShapeDtypeStruct((B, D), temb.dtype),
                   jax.ShapeDtypeStruct((B, D), temb.dtype)),
        grid_spec=pltpu.PrefetchScalarGridSpec(
            num_scalar_prefetch=0,
            grid=grid,
            in_specs=[
                pl.BlockSpec((B, tk), lambda n, k: (0, k)),    # temb
                pl.BlockSpec((tk, tn), lambda n, k: (k, n)),   # w_msa
                pl.BlockSpec((tk, tn), lambda n, k: (k, n)),   # w_mlp
                pl.BlockSpec((1, tn), lambda n, k: (0, n)),    # b_msa
                pl.BlockSpec((1, tn), lambda n, k: (0, n)),    # b_mlp
            ],
            out_specs=(pl.BlockSpec((B, tn), lambda n, k: (0, n)),
                       pl.BlockSpec((B, tn), lambda n, k: (0, n))),
            scratch_shapes=[pltpu.VMEM((B, tn), jnp.float32),
                            pltpu.VMEM((B, tn), jnp.float32)],
        ),
        compiler_params=pltpu.CompilerParams(
            dimension_semantics=("parallel", "arbitrary")),
    )(temb, w_msa, w_mlp, b_msa, b_mlp)

    # unsqueeze(1): pure layout plumbing, keep outside the kernel.
    return msa[:, None, :], mlp[:, None, :]


def _reference(temb, linear_w, linear_b):
    emb = jax.nn.silu(temb) @ linear_w.T + linear_b
    D = emb.shape[-1] // 2
    return emb[:, None, :D], emb[:, None, D:]


if __name__ == "__main__":
    # Small but lane-aligned shapes: batch=2, in_features=128, out=2*128.
    B, C = 2, 128
    D = C                      # out_features defaults to 2 * in_features
    key = jax.random.PRNGKey(0)
    k_t, k_w, k_b = jax.random.split(key, 3)

    temb = jax.random.normal(k_t, (B, C), dtype=jnp.float32)
    linear_w = jax.random.normal(k_w, (2 * D, C), dtype=jnp.float32) * 0.05
    linear_b = jax.random.normal(k_b, (2 * D,), dtype=jnp.float32) * 0.05

    gate_msa, gate_mlp = hunyuan_video_ada_norm(temb, linear_w, linear_b)
    gate_msa = jax.block_until_ready(gate_msa)
    gate_mlp = jax.block_until_ready(gate_mlp)

    ref_msa, ref_mlp = _reference(temb, linear_w, linear_b)
    assert gate_msa.shape == (B, 1, D) and gate_mlp.shape == (B, 1, D)
    assert jnp.allclose(gate_msa, ref_msa, atol=1e-4, rtol=1e-4), "gate_msa mismatch"
    assert jnp.allclose(gate_mlp, ref_mlp, atol=1e-4, rtol=1e-4), "gate_mlp mismatch"

    print("KERNEL_OK")
</pallas_src>

<mosaic_0001>
module attributes {stable_mosaic.version = 11 : i64} {
  func.func @_ada_norm_kernel(%arg0: i32, %arg1: i32, %arg2: memref<2x128xf32, #tpu.memory_space<vmem>>, %arg3: memref<128x128xf32, #tpu.memory_space<vmem>>, %arg4: memref<128x128xf32, #tpu.memory_space<vmem>>, %arg5: memref<1x128xf32, #tpu.memory_space<vmem>>, %arg6: memref<1x128xf32, #tpu.memory_space<vmem>>, %arg7: memref<2x128xf32, #tpu.memory_space<vmem>>, %arg8: memref<2x128xf32, #tpu.memory_space<vmem>>, %arg9: memref<2x128xf32, #tpu.memory_space<vmem>>, %arg10: memref<2x128xf32, #tpu.memory_space<vmem>>) attributes {dimension_semantics = [#tpu.dimension_semantics<parallel>, #tpu.dimension_semantics<arbitrary>], iteration_bounds = array<i64: 1, 1>, scalar_prefetch = 0 : i64, scratch_operands = 2 : i64, tpu.core_type = #tpu.core_type<tc>, window_params = [{transform_indices = @transform_0, window_bounds = array<i64: 2, 128>}, {transform_indices = @transform_1, window_bounds = array<i64: 128, 128>}, {transform_indices = @transform_2, window_bounds = array<i64: 128, 128>}, {transform_indices = @transform_3, window_bounds = array<i64: 1, 128>}, {transform_indices = @transform_4, window_bounds = array<i64: 1, 128>}, {transform_indices = @transform_5, window_bounds = array<i64: 2, 128>}, {transform_indices = @transform_6, window_bounds = array<i64: 2, 128>}]} {
    %c0_i32 = arith.constant 0 : i32
    %0 = arith.cmpi eq, %arg1, %c0_i32 : i32
    %1 = arith.extui %0 : i1 to i32
    %c0_i32_0 = arith.constant 0 : i32
    %2 = arith.cmpi ne, %1, %c0_i32_0 : i32
    scf.if %2 {
      %cst_18 = arith.constant 0.000000e+00 : f32
      %23 = vector.broadcast %cst_18 : f32 to vector<2x128xf32>
      %c0_19 = arith.constant 0 : index
      %c0_20 = arith.constant 0 : index
      %24 = vector.load %arg9[%c0_19, %c0_20] : memref<2x128xf32, #tpu.memory_space<vmem>>, vector<2x128xf32>
      tpu.vector_store %arg9[%c0_19, %c0_20], %23 {strides = array<i32>} : memref<2x128xf32, #tpu.memory_space<vmem>>, vector<2x128xf32>,
      %cst_21 = arith.constant 0.000000e+00 : f32
      %25 = vector.broadcast %cst_21 : f32 to vector<2x128xf32>
      %c0_22 = arith.constant 0 : index
      %c0_23 = arith.constant 0 : index
      %26 = vector.load %arg10[%c0_22, %c0_23] : memref<2x128xf32, #tpu.memory_space<vmem>>, vector<2x128xf32>
      tpu.vector_store %arg10[%c0_22, %c0_23], %25 {strides = array<i32>} : memref<2x128xf32, #tpu.memory_space<vmem>>, vector<2x128xf32>,
    } else {
    }
    %c0 = arith.constant 0 : index
    %c0_1 = arith.constant 0 : index
    %3 = vector.load %arg2[%c0, %c0_1] : memref<2x128xf32, #tpu.memory_space<vmem>>, vector<2x128xf32>
    %4 = arith.negf %3 : vector<2x128xf32>
    %5 = math.exp %4 : vector<2x128xf32>
    %cst = arith.constant 1.000000e+00 : f32
    %6 = vector.broadcast %cst : f32 to vector<2x128xf32>
    %7 = arith.addf %6, %5 : vector<2x128xf32>
    %8 = arith.divf %6, %7 : vector<2x128xf32>
    %9 = arith.mulf %3, %8 : vector<2x128xf32>
    %c0_2 = arith.constant 0 : index
    %c0_3 = arith.constant 0 : index
    %10 = vector.load %arg9[%c0_2, %c0_3] : memref<2x128xf32, #tpu.memory_space<vmem>>, vector<2x128xf32>
    %c0_4 = arith.constant 0 : index
    %c0_5 = arith.constant 0 : index
    %11 = vector.load %arg3[%c0_4, %c0_5] : memref<128x128xf32, #tpu.memory_space<vmem>>, vector<128x128xf32>
    %cst_6 = arith.constant dense<0.000000e+00> : vector<2x128xf32>
    %12 = tpu.matmul %9, %11, %cst_6 {dimension_numbers = #tpu.dot_dimension_numbers<[1], [0], [0], [1], [0, 0, 1, 1], [], []>} : vector<2x128xf32>, vector<128x128xf32>, vector<2x128xf32> -> vector<2x128xf32>
    %13 = arith.addf %10, %12 : vector<2x128xf32>
    %c0_7 = arith.constant 0 : index
    %c0_8 = arith.constant 0 : index
    %14 = vector.load %arg9[%c0_7, %c0_8] : memref<2x128xf32, #tpu.memory_space<vmem>>, vector<2x128xf32>
    tpu.vector_store %arg9[%c0_7, %c0_8], %13 {strides = array<i32>} : memref<2x128xf32, #tpu.memory_space<vmem>>, vector<2x128xf32>,
    %c0_9 = arith.constant 0 : index
    %c0_10 = arith.constant 0 : index
    %15 = vector.load %arg10[%c0_9, %c0_10] : memref<2x128xf32, #tpu.memory_space<vmem>>, vector<2x128xf32>
    %c0_11 = arith.constant 0 : index
    %c0_12 = arith.constant 0 : index
    %16 = vector.load %arg4[%c0_11, %c0_12] : memref<128x128xf32, #tpu.memory_space<vmem>>, vector<128x128xf32>
    %cst_13 = arith.constant dense<0.000000e+00> : vector<2x128xf32>
    %17 = tpu.matmul %9, %16, %cst_13 {dimension_numbers = #tpu.dot_dimension_numbers<[1], [0], [0], [1], [0, 0, 1, 1], [], []>} : vector<2x128xf32>, vector<128x128xf32>, vector<2x128xf32> -> vector<2x128xf32>
    %18 = arith.addf %15, %17 : vector<2x128xf32>
    %c0_14 = arith.constant 0 : index
    %c0_15 = arith.constant 0 : index
    %19 = vector.load %arg10[%c0_14, %c0_15] : memref<2x128xf32, #tpu.memory_space<vmem>>, vector<2x128xf32>
    tpu.vector_store %arg10[%c0_14, %c0_15], %18 {strides = array<i32>} : memref<2x128xf32, #tpu.memory_space<vmem>>, vector<2x128xf32>,
    %c0_i32_16 = arith.constant 0 : i32
    %20 = arith.cmpi eq, %arg1, %c0_i32_16 : i32
    %21 = arith.extui %20 : i1 to i32
    %c0_i32_17 = arith.constant 0 : i32
    %22 = arith.cmpi ne, %21, %c0_i32_17 : i32
    scf.if %22 {
      %c0_18 = arith.constant 0 : index
      %c0_19 = arith.constant 0 : index
      %23 = vector.load %arg9[%c0_18, %c0_19] : memref<2x128xf32, #tpu.memory_space<vmem>>, vector<2x128xf32>
      %c0_20 = arith.constant 0 : index
      %c0_21 = arith.constant 0 : index
      %24 = vector.load %arg5[%c0_20, %c0_21] : memref<1x128xf32, #tpu.memory_space<vmem>>, vector<1x128xf32>
      %25 = vector.broadcast %24 : vector<1x128xf32> to vector<2x128xf32>
      %26 = arith.addf %23, %25 : vector<2x128xf32>
      %c0_22 = arith.constant 0 : index
      %c0_23 = arith.constant 0 : index
      %27 = vector.load %arg7[%c0_22, %c0_23] : memref<2x128xf32, #tpu.memory_space<vmem>>, vector<2x128xf32>
      tpu.vector_store %arg7[%c0_22, %c0_23], %26 {strides = array<i32>} : memref<2x128xf32, #tpu.memory_space<vmem>>, vector<2x128xf32>,
      %c0_24 = arith.constant 0 : index
      %c0_25 = arith.constant 0 : index
      %28 = vector.load %arg10[%c0_24, %c0_25] : memref<2x128xf32, #tpu.memory_space<vmem>>, vector<2x128xf32>
      %c0_26 = arith.constant 0 : index
      %c0_27 = arith.constant 0 : index
      %29 = vector.load %arg6[%c0_26, %c0_27] : memref<1x128xf32, #tpu.memory_space<vmem>>, vector<1x128xf32>
      %30 = vector.broadcast %29 : vector<1x128xf32> to vector<2x128xf32>
      %31 = arith.addf %28, %30 : vector<2x128xf32>
      %c0_28 = arith.constant 0 : index
      %c0_29 = arith.constant 0 : index
      %32 = vector.load %arg8[%c0_28, %c0_29] : memref<2x128xf32, #tpu.memory_space<vmem>>, vector<2x128xf32>
      tpu.vector_store %arg8[%c0_28, %c0_29], %31 {strides = array<i32>} : memref<2x128xf32, #tpu.memory_space<vmem>>, vector<2x128xf32>,
    } else {
    }
    return
  }
  func.func @transform_0(%arg0: i32, %arg1: i32) -> (i32, i32) {
    %c0_i32 = arith.constant 0 : i32
    %c0_i32_0 = arith.constant 0 : i32
    return %c0_i32, %arg1 : i32, i32
  }
  func.func @transform_1(%arg0: i32, %arg1: i32) -> (i32, i32) {
    %c0_i32 = arith.constant 0 : i32
    return %arg1, %arg0 : i32, i32
  }
  func.func @transform_2(%arg0: i32, %arg1: i32) -> (i32, i32) {
    %c0_i32 = arith.constant 0 : i32
    return %arg1, %arg0 : i32, i32
  }
  func.func @transform_3(%arg0: i32, %arg1: i32) -> (i32, i32) {
    %c0_i32 = arith.constant 0 : i32
    %c0_i32_0 = arith.constant 0 : i32
    return %c0_i32, %arg0 : i32, i32
  }
  func.func @transform_4(%arg0: i32, %arg1: i32) -> (i32, i32) {
    %c0_i32 = arith.constant 0 : i32
    %c0_i32_0 = arith.constant 0 : i32
    return %c0_i32, %arg0 : i32, i32
  }
  func.func @transform_5(%arg0: i32, %arg1: i32) -> (i32, i32) {
    %c0_i32 = arith.constant 0 : i32
    %c0_i32_0 = arith.constant 0 : i32
    return %c0_i32, %arg0 : i32, i32
  }
  func.func @transform_6(%arg0: i32, %arg1: i32) -> (i32, i32) {
    %c0_i32 = arith.constant 0 : i32
    %c0_i32_0 = arith.constant 0 : i32
    return %c0_i32, %arg0 : i32, i32
  }
}

</mosaic_0001>

<bundles_post_ra>
// kernel: tpu_custom_call.1
= control target key start
LH: loop header
LB: loop body
LE: loop exit
PB: predicated region body
PF: predicated region fallthrough
CT: control target
= control target key end

     0   :  { %12 = vsyncpa [#allocation5], 0  ;;  %s728_s0 = inlined_call_operand.hbm [shape: f32[2,128], index: 0, kind: input, shape index: {}]   ;;  %s729_s1 = inlined_call_operand.hbm [shape: f32[128,128], index: 1, kind: input, shape index: {}]   ;;  %s730_s2 = inlined_call_operand.hbm [shape: f32[128,128], index: 2, kind: input, shape index: {}]   ;;  %s731_s3 = inlined_call_operand.vmem [shape: f32[1,128], index: 3, kind: input, shape index: {}]   ;;  %s732_s4 = inlined_call_operand.vmem [shape: f32[1,128], index: 4, kind: input, shape index: {}]   ;;  %s733_s5 = inlined_call_operand.hbm [shape: f32[2,128], index: 5, kind: output, shape index: {0}]   ;;  %s734_s6 = inlined_call_operand.hbm [shape: f32[2,128], index: 6, kind: output, shape index: {1}]  }
   0x1   :  { %13 = vsyncpa [#allocation8], 0 }
   0x2   :  { %14 = vsyncpa [#allocation6], 0 }
   0x3   :  { %15 = vsyncpa [#allocation12], 0  ;;  %s595_s21 = smov [#allocation7]   ;;  %s477_s25 = scalar_lea.hbm %s729_s1, 2048 }
   0x4   :  { %s31_s22 = sshll.u32 %s595_s21, 4  ;;  %p478_p0 = scmp.ne.s32.totalorder %s729_s1, %s477_s25  ;;  %s32_s22 = int_to_ptr.vmem [resolvable:$true] %s31_s22 }
   0x5   :  { %p481_p1 = scmp.lt.u32.totalorder %s477_s25, %s729_s1 }
   0x7   :  { %p483_p2 = pnand %p481_p1, %p478_p0 }
   0x9   :  { %486 = shalt.err (!%p483_p2)
}
   0xa   :  { %s487_s30 = scalar_lea.vmem %s32_s22, 2048  ;;  %p492_p4 = scmp.lt.s32.totalorder %s32_s22, %s32_s22 }
   0xb   :  { %p488_p3 = scmp.ne.s32.totalorder %s32_s22, %s487_s30  ;;  %p493_p5 = scmp.lt.s32.totalorder %s487_s30, %s487_s30 }
   0xd   :  { %p494_p6 = por %p493_p5, %p492_p4 }
   0xf   :  { %p495_p7 = pnand %p494_p6, %p488_p3 }
  0x11   :  { %498 = shalt.err (!%p495_p7)
}
  0x12   :  { %s596_s7 = smov 128   ;;  %s597_s8 = smov 8  }
  0x13   :  { %37 = dma.hbm_to_vmem [thread:$0]  %s729_s1, 2048, %s32_s22, [#allocation8], %s596_s7, %s596_s7, %s597_s8  }
  0x14   :  { %s598_s11 = smov [#allocation4]   ;;  %s599_s13 = smov [#allocation9]  }
  0x15   :  { %s22_s12 = sshll.u32 %s598_s11, 4  ;;  %s43_s14 = sshll.u32 %s599_s13, 4  ;;  %s23_s12 = int_to_ptr.vmem [resolvable:$true] %s22_s12  ;;  %s44_s14 = int_to_ptr.vmem [resolvable:$true] %s43_s14 }
  0x16   :  { %s499_s17 = scalar_lea.hbm %s728_s0, 32 }
  0x17   :  { %p500_p8 = scmp.ne.s32.totalorder %s728_s0, %s499_s17  ;;  %p503_p9 = scmp.lt.u32.totalorder %s499_s17, %s728_s0 }
  0x19   :  { %p505_p10 = pnand %p503_p9, %p500_p8 }
  0x1b   :  { %508 = shalt.err (!%p505_p10)
}
  0x1c   :  { %s509_s1 = scalar_lea.vmem %s23_s12, 32  ;;  %p514_p12 = scmp.lt.s32.totalorder %s23_s12, %s23_s12 }
  0x1d   :  { %p510_p11 = scmp.ne.s32.totalorder %s23_s12, %s509_s1  ;;  %p515_p13 = scmp.lt.s32.totalorder %s509_s1, %s509_s1 }
  0x1f   :  { %p516_p0 = por %p515_p13, %p514_p12 }
  0x21   :  { %p517_p1 = pnand %p516_p0, %p510_p11 }
  0x23   :  { %520 = shalt.err (!%p517_p1)
}
  0x24   :  { %25 = dma.hbm_to_vmem [thread:$0]  %s728_s0, 32, %s23_s12, [#allocation5]  }
  0x25   :  { %s521_s26 = scalar_lea.hbm %s730_s2, 2048 }
  0x26   :  { %p522_p2 = scmp.ne.s32.totalorder %s730_s2, %s521_s26  ;;  %p525_p3 = scmp.lt.u32.totalorder %s521_s26, %s730_s2 }
  0x28   :  { %p527_p4 = pnand %p525_p3, %p522_p2 }
  0x2a   :  { %530 = shalt.err (!%p527_p4)
}
  0x2b   :  { %s531_s9 = scalar_lea.vmem %s44_s14, 2048  ;;  %p536_p6 = scmp.lt.s32.totalorder %s44_s14, %s44_s14 }
  0x2c   :  { %p532_p5 = scmp.ne.s32.totalorder %s44_s14, %s531_s9  ;;  %p537_p7 = scmp.lt.s32.totalorder %s531_s9, %s531_s9 }
  0x2e   :  { %p538_p8 = por %p537_p7, %p536_p6 }
  0x30   :  { %p539_p9 = pnand %p538_p8, %p532_p5 }
  0x32   :  { %542 = shalt.err (!%p539_p9)
}
  0x33   :  { %49 = dma.hbm_to_vmem [thread:$0]  %s730_s2, 2048, %s44_s14, [#allocation8], %s596_s7, %s596_s7, %s597_s8  }
  0x34   :  { %587 = dma.done.wait [#allocation5], 32  }
  0x35   :  { %588 = vsyncadd [#allocation5], 4294967264 }
  0x36   :  { %589 = dma.done.wait [#allocation8], 4096  }
  0x37   :  { %590 = vsyncadd [#allocation8], 4294963200  ;;  %v600_v0 = vmov 0.0|0.0   ;;  %v601_v1 = vmov 0.0   ;;  %vm602_vm0 = vmmov 0   ;;  %v78_v2 = vld [vmem:[#allocation7] sm:$0xff] }
  0x38   :  { %415 = vmatprep.subr.bf16.mxu0 %v600_v0  ;;  %439 = vmatprep.subr.bf16.mxu1 %v600_v0  ;;  %67 = vst [vmem:[#allocation2] sm:$0x3] %v601_v1  ;;  %68 = vst [vmem:[#allocation3] sm:$0x3] %v601_v1  ;;  %v79_v3 = vld [vmem:[#allocation7 + $0x8] sm:$0xff]  ;;  %v167_v4 = vld [vmem:[#allocation9] sm:$0xff] }
  0x39   :  { %377 = vmatprep.mubr.msk.f32.mxu0 %vm602_vm0, %v601_v1  ;;  %412 = vmatprep.mubr.msk.f32.mxu1 %vm602_vm0, %v601_v1  ;;  %v416_v5 = vpack.c.bf16 %v79_v3, %v78_v2  ;;  %v168_v6 = vld [vmem:[#allocation9 + $0x8] sm:$0xff]  ;;  %v80_v7 = vld [vmem:[#allocation7 + $0x10] sm:$0xff]  ;;  %v81_v8 = vld [vmem:[#allocation7 + $0x18] sm:$0xff]  ;;  %s603_s8 = smov [#allocation10]   ;;  %s604_s14 = smov [#allocation11]  }
  0x3a   :  { %v440_v9 = vpack.c.bf16 %v168_v6, %v167_v4  ;;  %v169_v10 = vld [vmem:[#allocation9 + $0x10] sm:$0xff]  ;;  %v170_v11 = vld [vmem:[#allocation9 + $0x18] sm:$0xff]  ;;  %v419_v12 = vpack.c.bf16 %v81_v8, %v80_v7  ;;  %v82_v14 = vld [vmem:[#allocation7 + $0x20] sm:$0xff]  ;;  %s284_s11 = sshll.u32 %s603_s8, 4  ;;  %s294_s15 = sshll.u32 %s604_s14, 4  ;;  %s285_s11 = int_to_ptr.vmem [resolvable:$true] %s284_s11  ;;  %s295_s15 = int_to_ptr.vmem [resolvable:$true] %s294_s15 }
  0x3b   :  { %417 = vmatpush3.bf16.msra.mxu0 %v416_v5  ;;  %v443_v13 = vpack.c.bf16 %v170_v11, %v169_v10  ;;  %v83_v15 = vld [vmem:[#allocation7 + $0x28] sm:$0xff]  ;;  %v171_v16 = vld [vmem:[#allocation9 + $0x20] sm:$0xff]  ;;  %v84_v20 = vld [vmem:[#allocation7 + $0x30] sm:$0xff]  ;;  %s543_s16 = scalar_lea.vmem %s285_s11, 32  ;;  %p548_p11 = scmp.lt.s32.totalorder %s285_s11, %s285_s11 }
  0x3c   :  { %441 = vmatpush3.bf16.msra.mxu1 %v440_v9  ;;  %418 = vmatprep.subr.bf16.mxu0 %v600_v0  ;;  %v172_v17 = vld [vmem:[#allocation9 + $0x28] sm:$0xff]  ;;  %v422_v18 = vpack.c.bf16 %v83_v15, %v82_v14  ;;  %v85_v21 = vld [vmem:[#allocation7 + $0x38] sm:$0xff]  ;;  %v173_v22 = vld [vmem:[#allocation9 + $0x30] sm:$0xff]  ;;  %p544_p10 = scmp.ne.s32.totalorder %s285_s11, %s543_s16  ;;  %p549_p12 = scmp.lt.s32.totalorder %s543_s16, %s543_s16 }
  0x3d   :  { %442 = vmatprep.subr.bf16.mxu1 %v600_v0  ;;  %v446_v19 = vpack.c.bf16 %v172_v17, %v171_v16  ;;  %v174_v23 = vld [vmem:[#allocation9 + $0x38] sm:$0xff]  ;;  %v425_v25 = vpack.c.bf16 %v85_v21, %v84_v20  ;;  %v86_v28 = vld [vmem:[#allocation7 + $0x40] sm:$0xff]  ;;  %v87_v29 = vld [vmem:[#allocation7 + $0x48] sm:$0xff] }
  0x3e   :  { %v69_v24 = vld [vmem:[#allocation4] sm:$0x3]  ;;  %v449_v27 = vpack.c.bf16 %v174_v23, %v173_v22  ;;  %v175_v30 = vld [vmem:[#allocation9 + $0x40] sm:$0xff]  ;;  %v176_v31 = vld [vmem:[#allocation9 + $0x48] sm:$0xff]  ;;  %v428_v32 = vpack.c.bf16 %v87_v29, %v86_v28  ;;  %p550_p13 = por %p549_p12, %p548_p11 }
  0x3f   :  { %420 = vmatpush3.bf16.msra.mxu0 %v419_v12  ;;  %v308_v26 = vmul.f32 -1.442695, %v69_v24  ;;  %v452_v33 = vpack.c.bf16 %v176_v31, %v175_v30  ;;  %v88_v34 = vld [vmem:[#allocation7 + $0x50] sm:$0xff]  ;;  %v89_v35 = vld [vmem:[#allocation7 + $0x58] sm:$0xff]  ;;  %v90_v40 = vld [vmem:[#allocation7 + $0x60] sm:$0xff] }
  0x40   :  { %444 = vmatpush3.bf16.msra.mxu1 %v443_v13  ;;  %421 = vmatprep.subr.bf16.mxu0 %v600_v0  ;;  %v177_v36 = vld [vmem:[#allocation9 + $0x50] sm:$0xff]  ;;  %v178_v37 = vld [vmem:[#allocation9 + $0x58] sm:$0xff]  ;;  %v431_v38 = vpack.c.bf16 %v89_v35, %v88_v34  ;;  %v91_v41 = vld [vmem:[#allocation7 + $0x68] sm:$0xff]  ;;  %p551_p0 = pnand %p550_p13, %p544_p10 }
  0x41   :  { %445 = vmatprep.subr.bf16.mxu1 %v600_v0  ;;  %473 = vpow2.f32 %v308_v26  ;;  %v455_v39 = vpack.c.bf16 %v178_v37, %v177_v36  ;;  %v179_v42 = vld [vmem:[#allocation9 + $0x60] sm:$0xff]  ;;  %v180_v43 = vld [vmem:[#allocation9 + $0x68] sm:$0xff]  ;;  %v434_v45 = vpack.c.bf16 %v91_v41, %v90_v40  ;;  %v92_v47 = vld [vmem:[#allocation7 + $0x70] sm:$0xff] }
  0x42   :  { %v458_v46 = vpack.c.bf16 %v180_v43, %v179_v42  ;;  %v93_v48 = vld [vmem:[#allocation7 + $0x78] sm:$0xff]  ;;  %v181_v50 = vld [vmem:[#allocation9 + $0x70] sm:$0xff] }
  0x43   :  { %423 = vmatpush3.bf16.msra.mxu0 %v422_v18  ;;  %v182_v51 = vld [vmem:[#allocation9 + $0x78] sm:$0xff]  ;;  %v437_v52 = vpack.c.bf16 %v93_v48, %v92_v47 }
  0x44   :  { %447 = vmatpush3.bf16.msra.mxu1 %v446_v19  ;;  %424 = vmatprep.subr.bf16.mxu0 %v600_v0  ;;  %v461_v53 = vpack.c.bf16 %v182_v51, %v181_v50  ;;  %v77_v56 = vld [vmem:[#allocation2] sm:$0x3]  ;;  %v166_v57 = vld [vmem:[#allocation3] sm:$0x3] }
  0x45   :  { %448 = vmatprep.subr.bf16.mxu1 %v600_v0  ;;  %v310_v1 = vld [vmem:[%s732_s4] ss:$0 sm:$0xff] }
  0x47   :  { %426 = vmatpush3.bf16.msra.mxu0 %v425_v25 }
  0x48   :  { %450 = vmatpush3.bf16.msra.mxu1 %v449_v27  ;;  %427 = vmatprep.subr.bf16.mxu0 %v600_v0 }
  0x49   :  { %451 = vmatprep.subr.bf16.mxu1 %v600_v0 }
  0x4b   :  { %429 = vmatpush3.bf16.msra.mxu0 %v428_v32  ;;  %v474_v44 = vpop.eup %473 }
  0x4c   :  { %453 = vmatpush3.bf16.msra.mxu1 %v452_v33  ;;  %430 = vmatprep.subr.bf16.mxu0 %v600_v0  ;;  %v73_v49 = vadd.f32 1.0, %v474_v44 }
  0x4d   :  { %454 = vmatprep.subr.bf16.mxu1 %v600_v0 }
  0x4e   :  { %475 = vrcp.f32 %v73_v49 }
  0x4f   :  { %432 = vmatpush3.bf16.msra.mxu0 %v431_v38 }
  0x50   :  { %456 = vmatpush3.bf16.msra.mxu1 %v455_v39  ;;  %433 = vmatprep.subr.bf16.mxu0 %v600_v0 }
  0x51   :  { %457 = vmatprep.subr.bf16.mxu1 %v600_v0 }
  0x53   :  { %435 = vmatpush3.bf16.msra.mxu0 %v434_v45 }
  0x54   :  { %459 = vmatpush3.bf16.msra.mxu1 %v458_v46  ;;  %436 = vmatprep.subr.bf16.mxu0 %v600_v0 }
  0x55   :  { %460 = vmatprep.subr.bf16.mxu1 %v600_v0  ;;  %v309_v0 = vld [vmem:[%s731_s3] ss:$0 sm:$0xff] }
  0x57   :  { %438 = vmatpush3.bf16.msra.mxu0 %v437_v52 }
  0x58   :  { %462 = vmatpush3.bf16.msra.mxu1 %v461_v53  ;;  %v476_v54 = vpop.eup %475 }
  0x59   :  { %v76_v55 = vmul.f32 %v476_v54, %v69_v24 }
  0x5b   :  { %378 = vmatmul.mubr.f32.vlgmr.msra.gmra.mrb[0].mxu0 %v76_v55  ;;  %413 = vmatmul.mubr.f32.vlgmr.msra.gmra.mrb[0].mxu1 %v76_v55 }
 0x12e   :  { %v160_v58 = vpop.f32.mrb[0].mxu0  ;;  %v249_v59 = vpop.f32.mrb[0].mxu1 }
 0x12f   :  { %v164_v60 = vadd.f32 %v160_v58, %v77_v56  ;;  %v253_v61 = vadd.f32 %v249_v59, %v166_v57  ;;  %v379_v62 = vpop.f32.mrb[1].mxu0  ;;  %v414_v63 = vpop.f32.mrb[1].mxu1 }
 0x131   :  { %165 = vst [vmem:[#allocation2] sm:$0x3] %v164_v60  ;;  %254 = vst [vmem:[#allocation3] sm:$0x3] %v253_v61 }
 0x138   :  { %v258_v2 = vld [vmem:[#allocation2] sm:$0x3]  ;;  %v268_v3 = vld [vmem:[#allocation3] sm:$0x3] }
 0x139   :  { %v266_v4 = vadd.f32 %v309_v0, %v258_v2  ;;  %v276_v5 = vadd.f32 %v310_v1, %v268_v3 }
 0x13b   :  { %267 = vst [vmem:[#allocation10] sm:$0x3] %v266_v4  ;;  %277 = vst [vmem:[#allocation11] sm:$0x3] %v276_v5 }
 0x13c   :  { %554 = shalt.err (!%p551_p0)
}
 0x13d   :  { %s555_s4 = scalar_lea.hbm %s733_s5, 32 }
 0x13e   :  { %p556_p1 = scmp.ne.s32.totalorder %s733_s5, %s555_s4  ;;  %p559_p2 = scmp.lt.u32.totalorder %s555_s4, %s733_s5 }
 0x140   :  { %p561_p3 = pnand %p559_p2, %p556_p1 }
 0x142   :  { %564 = shalt.err (!%p561_p3)
}
 0x143   :  { %287 = dma.vmem_to_hbm [thread:$0]  %s285_s11, 32, %s733_s5, [#allocation6]  }
 0x144   :  { %s565_s23 = scalar_lea.vmem %s295_s15, 32  ;;  %p570_p5 = scmp.lt.s32.totalorder %s295_s15, %s295_s15 }
 0x145   :  { %p566_p4 = scmp.ne.s32.totalorder %s295_s15, %s565_s23  ;;  %p571_p6 = scmp.lt.s32.totalorder %s565_s23, %s565_s23 }
 0x147   :  { %p572_p7 = por %p571_p6, %p570_p5 }
 0x149   :  { %p573_p8 = pnand %p572_p7, %p566_p4 }
 0x14b   :  { %576 = shalt.err (!%p573_p8)
}
 0x14c   :  { %s577_s26 = scalar_lea.hbm %s734_s6, 32 }
 0x14d   :  { %p578_p9 = scmp.ne.s32.totalorder %s734_s6, %s577_s26  ;;  %p581_p10 = scmp.lt.u32.totalorder %s577_s26, %s734_s6 }
 0x14f   :  { %p583_p11 = pnand %p581_p10, %p578_p9 }
 0x151   :  { %586 = shalt.err (!%p583_p11)
}
 0x152   :  { %297 = dma.vmem_to_hbm [thread:$0]  %s295_s15, 32, %s734_s6, [#allocation12]  }
 0x153   :  { %591 = dma.done.wait [#allocation6], 32  }
 0x154   :  { %592 = vsyncadd [#allocation6], 4294967264 }
 0x155   :  { %593 = dma.done.wait [#allocation12], 32  }
 0x156   :  { %594 = vsyncadd [#allocation12], 4294967264 }
 0x157   :  { %304 = vsyncpa [#allocation5], 1 }
 0x158   :  { %305 = vsyncpa [#allocation8], 1 }
 0x159   :  { %306 = vsyncpa [#allocation6], 1 }
 0x15a   :  { %307 = vsyncpa [#allocation12], 1 }

</bundles_post_ra>
